<compile_context>
chip_gen: v7x
topology: tpu7x:2x2x1
jax: 0.10.0
libtpu: 0.0.40
codegen_flags: <defaults>
</compile_context>

<pallas_src>
import functools

import numpy as np
import jax
import jax.numpy as jnp
from jax import lax
from jax.experimental import pallas as pl
from jax.experimental.pallas import tpu as pltpu


# sigmoid(-1e4) == 0 and log1p(exp(-1e4)) == 0 exactly in f32 -> masked logits give 0 loss.
_PAD_LOGIT = -1e4
_EPS = 1e-12  # guards degenerate boxes (NaN would poison the masked sum)


def _round_up(x, m):
    return ((x + m - 1) // m) * m


def _choose_tile_bq(bq, c, itemsize, target_bytes=4 * 1024 * 1024):
    """Row tile over the B*Q axis: multiple of 8 (or == bq), ~target_bytes per input buffer."""
    if bq <= 8 or bq * c * itemsize <= target_bytes:
        return int(bq)
    t = (target_bytes // (c * itemsize)) // 8 * 8
    return int(max(8, min(t, (bq // 8) * 8)))


# ----------------------------------------------------------------------------
# Fused kernel.
#   grid = (L, cdiv(B*Q, tile_bq)); layer axis "parallel", row axis "arbitrary".
#   x_ref : (1, tile_bq, C) logits tile (native dtype, cast to f32 in-kernel)
#   m_ref : (1, 16, Npad)   packed matched pairs (rows 0-3 src cxcywh, 4-7 tgt cxcywh,
#                            8 matched logit, 9 validity mask, 10-15 zero)
#   out   : (1, 8, 128)     rows 0/1/2/3 = neg-focal / l1 / giou / focal-correction sums
#   acc   : (8, C) f32 scratch, resident dense-focal accumulator
# ----------------------------------------------------------------------------
def _boxer2d_fused_kernel(x_ref, m_ref, out_ref, acc_ref, *,
                          alpha, gamma, bq, tile_bq, c, need_row_mask, use_vreg_acc):
    r = pl.program_id(1)

    @pl.when(r == 0)
    def _init():
        acc_ref[...] = jnp.zeros_like(acc_ref)

    # ---- dense focal loss, negative-class term, over this logits tile (HBM read = 1x) ----
    x = x_ref[0].astype(jnp.float32)                                    # (tile_bq, C)
    if need_row_mask:
        row = lax.broadcasted_iota(jnp.int32, (tile_bq, c), 0)
        x = jnp.where(r * tile_bq + row < bq, x, _PAD_LOGIT)            # mask ragged tail

    e = jnp.exp(-jnp.abs(x))                                            # shared transcendental
    inv1pe = 1.0 / (1.0 + e)
    p = jnp.where(x >= 0.0, inv1pe, e * inv1pe)                         # == sigmoid(x)
    ce0 = jnp.maximum(x, 0.0) + jnp.log1p(e)                            # BCE(x, t=0)
    mod = p * p if gamma == 2 else p ** gamma                           # gamma==2 -> square
    f0 = ce0 * mod
    if alpha >= 0:
        f0 = (1.0 - alpha) * f0

    if use_vreg_acc:
        # reshape aligns with the native (8,128) sublane tiling -> free; sum(axis=0) = VPU adds
        acc_ref[...] += f0.reshape(tile_bq // 8, 8, c).sum(axis=0)
    else:
        # rare fallback (single row-step with tile_bq % 8 != 0): scalar accumulate, read [0,0]
        acc_ref[...] += jnp.sum(f0)

    # ---- epilogue on the last row tile: matched-pair losses + single output store --------
    @pl.when(r == pl.num_programs(1) - 1)
    def _finalize():
        neg_sum = jnp.sum(acc_ref[...]) if use_vreg_acc else acc_ref[0, 0]

        d = m_ref[0].astype(jnp.float32)            # (16, Npad)
        s = d[0:4]                                  # src cx,cy,w,h
        t = d[4:8]                                  # tgt cx,cy,w,h
        xm = d[8:9]                                 # matched logits
        msk = d[9:10]                               # validity mask

        # L1
        l1_sum = jnp.sum(jnp.abs(s - t) * msk)

        # GIoU of matched pairs
        def xyxy(b):
            cx, cy, w, h = b[0:1], b[1:2], b[2:3], b[3:4]
            return cx - 0.5 * w, cy - 0.5 * h, cx + 0.5 * w, cy + 0.5 * h

        sx0, sy0, sx1, sy1 = xyxy(s)
        tx0, ty0, tx1, ty1 = xyxy(t)
        area_s = (sx1 - sx0) * (sy1 - sy0)
        area_t = (tx1 - tx0) * (ty1 - ty0)
        iw = jnp.maximum(jnp.minimum(sx1, tx1) - jnp.maximum(sx0, tx0), 0.0)
        ih = jnp.maximum(jnp.minimum(sy1, ty1) - jnp.maximum(sy0, ty0), 0.0)
        inter = iw * ih
        union = area_s + area_t - inter
        cw = jnp.maximum(jnp.maximum(sx1, tx1) - jnp.minimum(sx0, tx0), 0.0)
        ch = jnp.maximum(jnp.maximum(sy1, ty1) - jnp.minimum(sy0, ty0), 0.0)
        area_c = cw * ch
        # eps clamps sanitize degenerate boxes (reference would emit inf/nan there).
        iou = inter / jnp.maximum(union, _EPS)
        giou = iou - (area_c - union) / jnp.maximum(area_c, _EPS)
        giou_sum = jnp.sum((1.0 - giou) * msk)

        # focal positive-class correction: sum_matched (f1(x) - f0(x))
        em = jnp.exp(-jnp.abs(xm))
        invm = 1.0 / (1.0 + em)
        pm = jnp.where(xm >= 0.0, invm, em * invm)
        logm = jnp.log1p(em)
        ce1 = jnp.maximum(xm, 0.0) - xm + logm       # BCE(x, t=1)
        ce0m = jnp.maximum(xm, 0.0) + logm           # BCE(x, t=0)
        omp = 1.0 - pm
        f1 = ce1 * (omp * omp if gamma == 2 else omp ** gamma)
        f0m = ce0m * (pm * pm if gamma == 2 else pm ** gamma)
        if alpha >= 0:
            f1 = alpha * f1
            f0m = (1.0 - alpha) * f0m
        fcorr_sum = jnp.sum((f1 - f0m) * msk)

        # one unmasked (8,128) output tile per layer
        row_o = lax.broadcasted_iota(jnp.int32, (1, 8, 128), 1)
        out_ref[...] = jnp.where(
            row_o == 0, neg_sum,
            jnp.where(row_o == 1, l1_sum,
                      jnp.where(row_o == 2, giou_sum,
                                jnp.where(row_o == 3, fcorr_sum, 0.0))))


def _per_layer_sums(logits_slab, packed, *, alpha, gamma):
    """logits_slab [L, B*Q, C] (native dtype), packed [L, 16, Npad] f32 -> four [L] f32 sums."""
    L, bq, c = logits_slab.shape
    npad = packed.shape[2]
    itemsize = jnp.dtype(logits_slab.dtype).itemsize
    tile_bq = _choose_tile_bq(bq, c, itemsize)
    num_r = -(-bq // tile_bq)
    need_row_mask = (bq % tile_bq) != 0
    use_vreg_acc = (tile_bq % 8) == 0

    out = pl.pallas_call(
        functools.partial(_boxer2d_fused_kernel,
                          alpha=alpha, gamma=gamma, bq=bq, tile_bq=tile_bq, c=c,
                          need_row_mask=need_row_mask, use_vreg_acc=use_vreg_acc),
        out_shape=jax.ShapeDtypeStruct((L, 8, 128), jnp.float32),
        grid=(L, num_r),
        in_specs=[
            pl.BlockSpec((1, tile_bq, c), lambda l, r: (l, r, 0)),   # logits tile
            pl.BlockSpec((1, 16, npad), lambda l, r: (l, 0, 0)),     # matched slab (layer-resident)
        ],
        out_specs=pl.BlockSpec((1, 8, 128), lambda l, r: (l, 0, 0)),
        scratch_shapes=[pltpu.VMEM((8, c), jnp.float32)],
        compiler_params=pltpu.CompilerParams(
            dimension_semantics=("parallel", "arbitrary"),
            vmem_limit_bytes=32 * 1024 * 1024,
        ),
    )(logits_slab, packed)
    return out[:, 0, 0], out[:, 1, 0], out[:, 2, 0], out[:, 3, 0]


# ----------------------------------------------------------------------------
# Fused, jitted per-layer loss computation (all glue stays on-device)
# ----------------------------------------------------------------------------
@functools.partial(jax.jit, static_argnames=("alpha", "gamma"))
def _boxer2d_loss_stack(logits, boxes, batch_idx, src_idx, labels, tgt_boxes,
                        num_boxes, *, alpha, gamma):
    # logits [L,B,Q,C], boxes [L,B,Q,4]; batch_idx/src_idx/labels [L,M]; tgt_boxes [L,M,4]
    L, B, Q, C = logits.shape
    M = batch_idx.shape[1]

    # free reshape (no pad, no copy, native dtype): C is the lane axis of the kernel
    slab = logits.reshape(L, B * Q, C)

    # tiny matched-pair gathers
    lsel = jnp.arange(L)[:, None]
    matched_logits = logits[lsel, batch_idx, src_idx, labels]          # [L, M]
    src_boxes = boxes[lsel, batch_idx, src_idx]                        # [L, M, 4]

    npad = _round_up(max(M, 1), 128)
    packed = jnp.concatenate(
        [
            jnp.transpose(src_boxes, (0, 2, 1)).astype(jnp.float32),   # rows 0-3
            jnp.transpose(tgt_boxes, (0, 2, 1)).astype(jnp.float32),   # rows 4-7
            matched_logits.astype(jnp.float32)[:, None, :],            # row 8
            jnp.ones((L, 1, M), jnp.float32),                          # row 9 (mask)
            jnp.zeros((L, 6, M), jnp.float32),                         # rows 10-15
        ],
        axis=1,
    )
    packed = jnp.pad(packed, ((0, 0), (0, 0), (0, npad - M)))          # zero pad -> mask 0

    neg, l1, giou, fcorr = _per_layer_sums(slab, packed, alpha=alpha, gamma=gamma)

    inv_nb = 1.0 / num_boxes
    return {
        "loss_ce": (neg + fcorr) * inv_nb,
        "loss_bbox": l1 * inv_nb,
        "loss_giou": giou * inv_nb,
    }


# ----------------------------------------------------------------------------
# Boxer2DLoss forward-pass replication
# ----------------------------------------------------------------------------
def simple_matcher(outputs, targets):
    # TODO(synk): the real Boxer2D matcher is a Hungarian assignment (no clean Pallas
    # equivalent); a fixed identity assignment (target j <-> query j) is used here.
    return [
        (np.arange(len(t["labels"]), dtype=np.int32),
         np.arange(len(t["labels"]), dtype=np.int32))
        for t in targets
    ]


class Boxer2DLoss:
    """Focal-label + box losses for main and aux decoder layers, fused into 1 Pallas call."""

    def __init__(self, num_classes, matcher, weight_dict, losses, iter_per_update):
        self.num_classes = num_classes
        self.matcher = matcher
        self.weight_dict = weight_dict
        self.losses = list(losses)
        self.iter_per_update = iter_per_update
        self.focal_alpha = 0.25
        self.focal_gamma = 2
        for loss in self.losses:
            if loss not in ("boxes", "focal_labels"):
                raise ValueError(
                    "Only boxes|focal_labels are supported here. Found {}".format(loss))
        # TODO(synk): 'masks' and 'enc_outputs' branches omitted in this synthetic setup.

    def forward(self, outputs, targets):
        outputs_without_aux = {
            k: v for k, v in outputs.items() if k not in ("aux_outputs", "enc_outputs")
        }
        num_boxes = max(float(sum(len(t["labels"]) for t in targets)), 1.0)
        # TODO(synk): distributed all_reduce of num_boxes omitted (single-device setup).

        layer_outputs = list(outputs.get("aux_outputs", [])) + [outputs_without_aux]
        suffixes = [f"_{i}" for i in range(len(layer_outputs) - 1)] + [""]

        # Host-side matcher + index stacking (matcher output / targets are host data;
        # device arrays are never pulled to the host here).
        bidx, sidx, lbls, tgtb = [], [], [], []
        for lo in layer_outputs:
            indices = self.matcher(lo, targets)
            b_l, s_l, c_l, t_l = [], [], [], []
            for b, (src_i, tgt_i) in enumerate(indices):
                src_i = np.asarray(src_i, np.int32)
                tgt_i = np.asarray(tgt_i, np.int32)
                b_l.append(np.full(src_i.shape, b, np.int32))
                s_l.append(src_i)
                c_l.append(np.asarray(targets[b]["labels"])[tgt_i].astype(np.int32))
                t_l.append(np.asarray(targets[b]["boxes"], np.float32)[tgt_i])
            bidx.append(np.concatenate(b_l))
            sidx.append(np.concatenate(s_l))
            lbls.append(np.concatenate(c_l))
            tgtb.append(np.concatenate(t_l, axis=0))

        # The exact focal decomposition assumes unique (batch, query, label) matches per
        # layer and an equal match count per layer (holds for Hungarian/identity matchers).
        assert len({len(s) for s in sidx}) == 1, "matcher must return equal pair counts per layer"

        batch_idx = jnp.asarray(np.stack(bidx))
        src_idx = jnp.asarray(np.stack(sidx))
        labels = jnp.asarray(np.stack(lbls))
        tgt_boxes = jnp.asarray(np.stack(tgtb))

        # TODO(synk): if the decoder already emits stacked [L,B,Q,C] tensors, pass them
        # directly here to skip this stack copy (kept because inputs arrive per-layer).
        logits = jnp.stack([lo["pred_logits"] for lo in layer_outputs])   # native dtype kept
        boxes = jnp.stack([lo["pred_boxes"] for lo in layer_outputs])

        per_layer = _boxer2d_loss_stack(
            logits, boxes, batch_idx, src_idx, labels, tgt_boxes,
            jnp.float32(num_boxes), alpha=self.focal_alpha, gamma=self.focal_gamma)

        losses = {}
        for li, suf in enumerate(suffixes):
            if "focal_labels" in self.losses:
                losses["loss_ce" + suf] = per_layer["loss_ce"][li]
            if "boxes" in self.losses:
                losses["loss_bbox" + suf] = per_layer["loss_bbox"][li]
                losses["loss_giou" + suf] = per_layer["loss_giou"][li]
        return losses


# ----------------------------------------------------------------------------
# Pure NumPy (float64) reference of the original PyTorch formulas
# ----------------------------------------------------------------------------
def _ref_forward(outputs, targets, num_classes, alpha=0.25, gamma=2):
    num_boxes = max(float(sum(len(t["labels"]) for t in targets)), 1.0)
    main = {k: v for k, v in outputs.items() if k not in ("aux_outputs", "enc_outputs")}
    layer_outputs = list(outputs.get("aux_outputs", [])) + [main]
    suffixes = [f"_{i}" for i in range(len(layer_outputs) - 1)] + [""]
    ref = {}
    for lo, suf in zip(layer_outputs, suffixes):
        logits = np.asarray(lo["pred_logits"], np.float64)
        pboxes = np.asarray(lo["pred_boxes"], np.float64)
        B, Q, C = logits.shape
        indices = simple_matcher(lo, targets)
        onehot = np.zeros((B, Q, C), np.float64)
        src_list, tgt_list = [], []
        for b, (si, ti) in enumerate(indices):
            si = np.asarray(si)
            ti = np.asarray(ti)
            lab = np.asarray(targets[b]["labels"])[ti]
            onehot[b, si, lab] = 1.0
            src_list.append(pboxes[b][si])
            tgt_list.append(np.asarray(targets[b]["boxes"], np.float64)[ti])

        # focal loss
        x, t = logits, onehot
        prob = 1.0 / (1.0 + np.exp(-x))
        ce = np.maximum(x, 0.0) - x * t + np.log1p(np.exp(-np.abs(x)))
        p_t = prob * t + (1 - prob) * (1 - t)
        loss = ce * (1 - p_t) ** gamma
        a_t = alpha * t + (1 - alpha) * (1 - t)
        ref["loss_ce" + suf] = float((a_t * loss).sum() / num_boxes)

        # box losses
        src = np.concatenate(src_list, axis=0)
        tgt = np.concatenate(tgt_list, axis=0)

        def xyxy(b):
            cx, cy, w, h = b[:, 0], b[:, 1], b[:, 2], b[:, 3]
            return np.stack([cx - w / 2, cy - h / 2, cx + w / 2, cy + h / 2], -1)

        s, tt = xyxy(src), xyxy(tgt)
        area_s = (s[:, 2] - s[:, 0]) * (s[:, 3] - s[:, 1])
        area_t = (tt[:, 2] - tt[:, 0]) * (tt[:, 3] - tt[:, 1])
        lt = np.maximum(s[:, :2], tt[:, :2])
        rb = np.minimum(s[:, 2:], tt[:, 2:])
        wh = np.clip(rb - lt, 0, None)
        inter = wh[:, 0] * wh[:, 1]
        union = area_s + area_t - inter
        iou = inter / union
        clt = np.minimum(s[:, :2], tt[:, :2])
        crb = np.maximum(s[:, 2:], tt[:, 2:])
        cwh = np.clip(crb - clt, 0, None)
        area_c = cwh[:, 0] * cwh[:, 1]
        giou = iou - (area_c - union) / area_c
        ref["loss_bbox" + suf] = float(np.abs(src - tgt).sum() / num_boxes)
        ref["loss_giou" + suf] = float((1 - giou).sum() / num_boxes)
    return ref


# ----------------------------------------------------------------------------
# Main
# ----------------------------------------------------------------------------
if __name__ == "__main__":
    B, Q, C = 2, 8, 4  # batch, queries, classes

    key = jax.random.PRNGKey(0)
    k1, k2, k3, k4, k5, k6 = jax.random.split(key, 6)

    pred_logits = jax.random.normal(k1, (B, Q, C), jnp.float32)
    pred_boxes = jax.nn.sigmoid(jax.random.normal(k2, (B, Q, 4), jnp.float32))
    aux_logits = jax.random.normal(k3, (B, Q, C), jnp.float32)
    aux_boxes = jax.nn.sigmoid(jax.random.normal(k4, (B, Q, 4), jnp.float32))

    # targets: batch 0 has 3 boxes, batch 1 has 2 boxes -> num_boxes = 5
    n_tgt = [3, 2]
    targets = []
    tk = k5
    for b in range(B):
        tk, ka, kb = jax.random.split(tk, 3)
        centers = jax.random.uniform(ka, (n_tgt[b], 2), jnp.float32, 0.3, 0.7)
        sizes = jax.random.uniform(kb, (n_tgt[b], 2), jnp.float32, 0.1, 0.4)
        boxes = np.asarray(jnp.concatenate([centers, sizes], axis=-1))
        labels = np.asarray(
            jax.random.randint(jax.random.fold_in(k6, b), (n_tgt[b],), 0, C), np.int32
        )
        targets.append({"boxes": boxes, "labels": labels})

    outputs = {
        "pred_logits": pred_logits,
        "pred_boxes": pred_boxes,
        "aux_outputs": [{"pred_logits": aux_logits, "pred_boxes": aux_boxes}],
    }

    criterion = Boxer2DLoss(
        num_classes=C,
        matcher=simple_matcher,
        weight_dict={"loss_ce": 2.0, "loss_bbox": 5.0, "loss_giou": 2.0},
        losses=["boxes", "focal_labels"],
        iter_per_update=1,
    )

    losses = criterion.forward(outputs, targets)
    losses = jax.block_until_ready(losses)

    ref = _ref_forward(outputs, targets, C)
    for k in ref:
        np.testing.assert_allclose(float(losses[k]), ref[k], rtol=1e-4, atol=1e-5)

    print("KERNEL_OK")
</pallas_src>

<mosaic_0001>
module attributes {stable_mosaic.version = 11 : i64} {
  func.func @_boxer2d_fused_kernel(%arg0: i32, %arg1: i32, %arg2: memref<1x16x4xf32, #tpu.memory_space<vmem>>, %arg3: memref<1x16x128xf32, #tpu.memory_space<vmem>>, %arg4: memref<1x8x128xf32, #tpu.memory_space<vmem>>, %arg5: memref<8x4xf32, #tpu.memory_space<vmem>>) attributes {dimension_semantics = [#tpu.dimension_semantics<parallel>, #tpu.dimension_semantics<arbitrary>], iteration_bounds = array<i64: 2, 1>, scalar_prefetch = 0 : i64, scratch_operands = 1 : i64, tpu.core_type = #tpu.core_type<tc>, window_params = [{transform_indices = @transform_0, window_bounds = array<i64: 1, 16, 4>}, {transform_indices = @transform_1, window_bounds = array<i64: 1, 16, 128>}, {transform_indices = @transform_2, window_bounds = array<i64: 1, 8, 128>}]} {
    %c0_i32 = arith.constant 0 : i32
    %0 = arith.cmpi eq, %arg1, %c0_i32 : i32
    %1 = arith.extui %0 : i1 to i32
    %c0_i32_0 = arith.constant 0 : i32
    %2 = arith.cmpi ne, %1, %c0_i32_0 : i32
    scf.if %2 {
      %cst_15 = arith.constant 0.000000e+00 : f32
      %33 = vector.broadcast %cst_15 : f32 to vector<8x4xf32>
      %c0_16 = arith.constant 0 : index
      %c0_17 = arith.constant 0 : index
      %34 = vector.load %arg5[%c0_16, %c0_17] : memref<8x4xf32, #tpu.memory_space<vmem>>, vector<8x4xf32>
      tpu.vector_store %arg5[%c0_16, %c0_17], %33 {strides = array<i32>} : memref<8x4xf32, #tpu.memory_space<vmem>>, vector<8x4xf32>,
    } else {
    }
    %c0 = arith.constant 0 : index
    %c0_1 = arith.constant 0 : index
    %c0_2 = arith.constant 0 : index
    %3 = vector.load %arg2[%c0, %c0_1, %c0_2] : memref<1x16x4xf32, #tpu.memory_space<vmem>>, vector<1x16x4xf32>
    %4 = vector.shape_cast %3 : vector<1x16x4xf32> to vector<16x4xf32>
    %5 = math.absf %4 : vector<16x4xf32>
    %cst = arith.constant 0.000000e+00 : f32
    %6 = vector.broadcast %cst : f32 to vector<16x4xf32>
    %7 = arith.subf %6, %5 : vector<16x4xf32>
    %8 = math.exp %7 : vector<16x4xf32>
    %cst_3 = arith.constant 1.000000e+00 : f32
    %9 = vector.broadcast %cst_3 : f32 to vector<16x4xf32>
    %10 = arith.addf %9, %8 : vector<16x4xf32>
    %cst_4 = arith.constant 1.000000e+00 : f32
    %11 = vector.broadcast %cst_4 : f32 to vector<16x4xf32>
    %12 = arith.divf %11, %10 : vector<16x4xf32>
    %cst_5 = arith.constant 0.000000e+00 : f32
    %13 = vector.broadcast %cst_5 : f32 to vector<16x4xf32>
    %14 = arith.cmpf oge, %4, %13 : vector<16x4xf32>
    %15 = arith.mulf %8, %12 : vector<16x4xf32>
    %16 = arith.select %14, %12, %15 : vector<16x4xi1>, vector<16x4xf32>
    %cst_6 = arith.constant 0.000000e+00 : f32
    %17 = vector.broadcast %cst_6 : f32 to vector<16x4xf32>
    %18 = arith.maximumf %4, %17 : vector<16x4xf32>
    %19 = math.log1p %8 : vector<16x4xf32>
    %20 = arith.addf %18, %19 : vector<16x4xf32>
    %21 = arith.mulf %16, %16 : vector<16x4xf32>
    %22 = arith.mulf %20, %21 : vector<16x4xf32>
    %cst_7 = arith.constant 7.500000e-01 : f32
    %23 = vector.broadcast %cst_7 : f32 to vector<16x4xf32>
    %24 = arith.mulf %23, %22 : vector<16x4xf32>
    %c0_8 = arith.constant 0 : index
    %c0_9 = arith.constant 0 : index
    %25 = vector.load %arg5[%c0_8, %c0_9] : memref<8x4xf32, #tpu.memory_space<vmem>>, vector<8x4xf32>
    %26 = vector.shape_cast %24 : vector<16x4xf32> to vector<2x8x4xf32>
    %cst_10 = arith.constant dense<0.000000e+00> : vector<8x4xf32>
    %27 = vector.multi_reduction <add>, %26, %cst_10 [0] : vector<2x8x4xf32> to vector<8x4xf32>
    %28 = arith.addf %25, %27 : vector<8x4xf32>
    %c0_11 = arith.constant 0 : index
    %c0_12 = arith.constant 0 : index
    %29 = vector.load %arg5[%c0_11, %c0_12] : memref<8x4xf32, #tpu.memory_space<vmem>>, vector<8x4xf32>
    tpu.vector_store %arg5[%c0_11, %c0_12], %28 {strides = array<i32>} : memref<8x4xf32, #tpu.memory_space<vmem>>, vector<8x4xf32>,
    %c0_i32_13 = arith.constant 0 : i32
    %30 = arith.cmpi eq, %arg1, %c0_i32_13 : i32
    %31 = arith.extui %30 : i1 to i32
    %c0_i32_14 = arith.constant 0 : i32
    %32 = arith.cmpi ne, %31, %c0_i32_14 : i32
    scf.if %32 {
      %c0_15 = arith.constant 0 : index
      %c0_16 = arith.constant 0 : index
      %33 = vector.load %arg5[%c0_15, %c0_16] : memref<8x4xf32, #tpu.memory_space<vmem>>, vector<8x4xf32>
      %34 = vector.shape_cast %33 : vector<8x4xf32> to vector<1x8x4xf32>
      %cst_17 = arith.constant dense<0.000000e+00> : vector<1xf32>
      %35 = vector.multi_reduction <add>, %34, %cst_17 [1, 2] : vector<1x8x4xf32> to vector<1xf32>
      %36 = vector.shape_cast %35 : vector<1xf32> to vector<1x1x1xf32>
      %37 = vector.extract %36[0, 0, 0] : f32 from vector<1x1x1xf32>
      %c0_18 = arith.constant 0 : index
      %c0_19 = arith.constant 0 : index
      %c0_20 = arith.constant 0 : index
      %38 = vector.load %arg3[%c0_18, %c0_19, %c0_20] : memref<1x16x128xf32, #tpu.memory_space<vmem>>, vector<1x16x128xf32>
      %39 = vector.shape_cast %38 : vector<1x16x128xf32> to vector<16x128xf32>
      %40 = vector.extract_strided_slice %39 {offsets = [0, 0], sizes = [4, 128], strides = [1, 1]} : vector<16x128xf32> to vector<4x128xf32>
      %41 = vector.extract_strided_slice %39 {offsets = [4, 0], sizes = [4, 128], strides = [1, 1]} : vector<16x128xf32> to vector<4x128xf32>
      %42 = vector.extract_strided_slice %39 {offsets = [8, 0], sizes = [1, 128], strides = [1, 1]} : vector<16x128xf32> to vector<1x128xf32>
      %43 = vector.extract_strided_slice %39 {offsets = [9, 0], sizes = [1, 128], strides = [1, 1]} : vector<16x128xf32> to vector<1x128xf32>
      %44 = arith.subf %40, %41 : vector<4x128xf32>
      %45 = math.absf %44 : vector<4x128xf32>
      %46 = vector.broadcast %43 : vector<1x128xf32> to vector<4x128xf32>
      %47 = arith.mulf %45, %46 : vector<4x128xf32>
      %48 = vector.shape_cast %47 : vector<4x128xf32> to vector<1x4x128xf32>
      %cst_21 = arith.constant dense<0.000000e+00> : vector<1xf32>
      %49 = vector.multi_reduction <add>, %48, %cst_21 [1, 2] : vector<1x4x128xf32> to vector<1xf32>
      %50 = vector.shape_cast %49 : vector<1xf32> to vector<1x1x1xf32>
      %51 = vector.extract %50[0, 0, 0] : f32 from vector<1x1x1xf32>
      %52 = vector.extract_strided_slice %40 {offsets = [0, 0], sizes = [1, 128], strides = [1, 1]} : vector<4x128xf32> to vector<1x128xf32>
      %53 = vector.extract_strided_slice %40 {offsets = [1, 0], sizes = [1, 128], strides = [1, 1]} : vector<4x128xf32> to vector<1x128xf32>
      %54 = vector.extract_strided_slice %40 {offsets = [2, 0], sizes = [1, 128], strides = [1, 1]} : vector<4x128xf32> to vector<1x128xf32>
      %55 = vector.extract_strided_slice %40 {offsets = [3, 0], sizes = [1, 128], strides = [1, 1]} : vector<4x128xf32> to vector<1x128xf32>
      %cst_22 = arith.constant 5.000000e-01 : f32
      %56 = vector.broadcast %cst_22 : f32 to vector<1x128xf32>
      %57 = arith.mulf %56, %54 : vector<1x128xf32>
      %58 = arith.subf %52, %57 : vector<1x128xf32>
      %cst_23 = arith.constant 5.000000e-01 : f32
      %59 = vector.broadcast %cst_23 : f32 to vector<1x128xf32>
      %60 = arith.mulf %59, %55 : vector<1x128xf32>
      %61 = arith.subf %53, %60 : vector<1x128xf32>
      %cst_24 = arith.constant 5.000000e-01 : f32
      %62 = vector.broadcast %cst_24 : f32 to vector<1x128xf32>
      %63 = arith.mulf %62, %54 : vector<1x128xf32>
      %64 = arith.addf %52, %63 : vector<1x128xf32>
      %cst_25 = arith.constant 5.000000e-01 : f32
      %65 = vector.broadcast %cst_25 : f32 to vector<1x128xf32>
      %66 = arith.mulf %65, %55 : vector<1x128xf32>
      %67 = arith.addf %53, %66 : vector<1x128xf32>
      %68 = vector.extract_strided_slice %41 {offsets = [0, 0], sizes = [1, 128], strides = [1, 1]} : vector<4x128xf32> to vector<1x128xf32>
      %69 = vector.extract_strided_slice %41 {offsets = [1, 0], sizes = [1, 128], strides = [1, 1]} : vector<4x128xf32> to vector<1x128xf32>
      %70 = vector.extract_strided_slice %41 {offsets = [2, 0], sizes = [1, 128], strides = [1, 1]} : vector<4x128xf32> to vector<1x128xf32>
      %71 = vector.extract_strided_slice %41 {offsets = [3, 0], sizes = [1, 128], strides = [1, 1]} : vector<4x128xf32> to vector<1x128xf32>
      %cst_26 = arith.constant 5.000000e-01 : f32
      %72 = vector.broadcast %cst_26 : f32 to vector<1x128xf32>
      %73 = arith.mulf %72, %70 : vector<1x128xf32>
      %74 = arith.subf %68, %73 : vector<1x128xf32>
      %cst_27 = arith.constant 5.000000e-01 : f32
      %75 = vector.broadcast %cst_27 : f32 to vector<1x128xf32>
      %76 = arith.mulf %75, %71 : vector<1x128xf32>
      %77 = arith.subf %69, %76 : vector<1x128xf32>
      %cst_28 = arith.constant 5.000000e-01 : f32
      %78 = vector.broadcast %cst_28 : f32 to vector<1x128xf32>
      %79 = arith.mulf %78, %70 : vector<1x128xf32>
      %80 = arith.addf %68, %79 : vector<1x128xf32>
      %cst_29 = arith.constant 5.000000e-01 : f32
      %81 = vector.broadcast %cst_29 : f32 to vector<1x128xf32>
      %82 = arith.mulf %81, %71 : vector<1x128xf32>
      %83 = arith.addf %69, %82 : vector<1x128xf32>
      %84 = arith.subf %64, %58 : vector<1x128xf32>
      %85 = arith.subf %67, %61 : vector<1x128xf32>
      %86 = arith.mulf %84, %85 : vector<1x128xf32>
      %87 = arith.subf %80, %74 : vector<1x128xf32>
      %88 = arith.subf %83, %77 : vector<1x128xf32>
      %89 = arith.mulf %87, %88 : vector<1x128xf32>
      %90 = arith.minimumf %64, %80 : vector<1x128xf32>
      %91 = arith.maximumf %58, %74 : vector<1x128xf32>
      %92 = arith.subf %90, %91 : vector<1x128xf32>
      %cst_30 = arith.constant 0.000000e+00 : f32
      %93 = vector.broadcast %cst_30 : f32 to vector<1x128xf32>
      %94 = arith.maximumf %92, %93 : vector<1x128xf32>
      %95 = arith.minimumf %67, %83 : vector<1x128xf32>
      %96 = arith.maximumf %61, %77 : vector<1x128xf32>
      %97 = arith.subf %95, %96 : vector<1x128xf32>
      %cst_31 = arith.constant 0.000000e+00 : f32
      %98 = vector.broadcast %cst_31 : f32 to vector<1x128xf32>
      %99 = arith.maximumf %97, %98 : vector<1x128xf32>
      %100 = arith.mulf %94, %99 : vector<1x128xf32>
      %101 = arith.addf %86, %89 : vector<1x128xf32>
      %102 = arith.subf %101, %100 : vector<1x128xf32>
      %103 = arith.maximumf %64, %80 : vector<1x128xf32>
      %104 = arith.minimumf %58, %74 : vector<1x128xf32>
      %105 = arith.subf %103, %104 : vector<1x128xf32>
      %cst_32 = arith.constant 0.000000e+00 : f32
      %106 = vector.broadcast %cst_32 : f32 to vector<1x128xf32>
      %107 = arith.maximumf %105, %106 : vector<1x128xf32>
      %108 = arith.maximumf %67, %83 : vector<1x128xf32>
      %109 = arith.minimumf %61, %77 : vector<1x128xf32>
      %110 = arith.subf %108, %109 : vector<1x128xf32>
      %cst_33 = arith.constant 0.000000e+00 : f32
      %111 = vector.broadcast %cst_33 : f32 to vector<1x128xf32>
      %112 = arith.maximumf %110, %111 : vector<1x128xf32>
      %113 = arith.mulf %107, %112 : vector<1x128xf32>
      %cst_34 = arith.constant 9.99999996E-13 : f32
      %114 = vector.broadcast %cst_34 : f32 to vector<1x128xf32>
      %115 = arith.maximumf %102, %114 : vector<1x128xf32>
      %116 = arith.divf %100, %115 : vector<1x128xf32>
      %117 = arith.subf %113, %102 : vector<1x128xf32>
      %cst_35 = arith.constant 9.99999996E-13 : f32
      %118 = vector.broadcast %cst_35 : f32 to vector<1x128xf32>
      %119 = arith.maximumf %113, %118 : vector<1x128xf32>
      %120 = arith.divf %117, %119 : vector<1x128xf32>
      %121 = arith.subf %116, %120 : vector<1x128xf32>
      %cst_36 = arith.constant 1.000000e+00 : f32
      %122 = vector.broadcast %cst_36 : f32 to vector<1x128xf32>
      %123 = arith.subf %122, %121 : vector<1x128xf32>
      %124 = arith.mulf %123, %43 : vector<1x128xf32>
      %125 = vector.shape_cast %124 : vector<1x128xf32> to vector<1x1x128xf32>
      %cst_37 = arith.constant dense<0.000000e+00> : vector<1xf32>
      %126 = vector.multi_reduction <add>, %125, %cst_37 [1, 2] : vector<1x1x128xf32> to vector<1xf32>
      %127 = vector.shape_cast %126 : vector<1xf32> to vector<1x1x1xf32>
      %128 = vector.extract %127[0, 0, 0] : f32 from vector<1x1x1xf32>
      %129 = math.absf %42 : vector<1x128xf32>
      %cst_38 = arith.constant 0.000000e+00 : f32
      %130 = vector.broadcast %cst_38 : f32 to vector<1x128xf32>
      %131 = arith.subf %130, %129 : vector<1x128xf32>
      %132 = math.exp %131 : vector<1x128xf32>
      %cst_39 = arith.constant 1.000000e+00 : f32
      %133 = vector.broadcast %cst_39 : f32 to vector<1x128xf32>
      %134 = arith.addf %133, %132 : vector<1x128xf32>
      %cst_40 = arith.constant 1.000000e+00 : f32
      %135 = vector.broadcast %cst_40 : f32 to vector<1x128xf32>
      %136 = arith.divf %135, %134 : vector<1x128xf32>
      %cst_41 = arith.constant 0.000000e+00 : f32
      %137 = vector.broadcast %cst_41 : f32 to vector<1x128xf32>
      %138 = arith.cmpf oge, %42, %137 : vector<1x128xf32>
      %139 = arith.mulf %132, %136 : vector<1x128xf32>
      %140 = arith.select %138, %136, %139 : vector<1x128xi1>, vector<1x128xf32>
      %141 = math.log1p %132 : vector<1x128xf32>
      %cst_42 = arith.constant 0.000000e+00 : f32
      %142 = vector.broadcast %cst_42 : f32 to vector<1x128xf32>
      %143 = arith.maximumf %42, %142 : vector<1x128xf32>
      %144 = arith.subf %143, %42 : vector<1x128xf32>
      %145 = arith.addf %144, %141 : vector<1x128xf32>
      %cst_43 = arith.constant 0.000000e+00 : f32
      %146 = vector.broadcast %cst_43 : f32 to vector<1x128xf32>
      %147 = arith.maximumf %42, %146 : vector<1x128xf32>
      %148 = arith.addf %147, %141 : vector<1x128xf32>
      %cst_44 = arith.constant 1.000000e+00 : f32
      %149 = vector.broadcast %cst_44 : f32 to vector<1x128xf32>
      %150 = arith.subf %149, %140 : vector<1x128xf32>
      %151 = arith.mulf %150, %150 : vector<1x128xf32>
      %152 = arith.mulf %145, %151 : vector<1x128xf32>
      %153 = arith.mulf %140, %140 : vector<1x128xf32>
      %154 = arith.mulf %148, %153 : vector<1x128xf32>
      %cst_45 = arith.constant 2.500000e-01 : f32
      %155 = vector.broadcast %cst_45 : f32 to vector<1x128xf32>
      %156 = arith.mulf %155, %152 : vector<1x128xf32>
      %cst_46 = arith.constant 7.500000e-01 : f32
      %157 = vector.broadcast %cst_46 : f32 to vector<1x128xf32>
      %158 = arith.mulf %157, %154 : vector<1x128xf32>
      %159 = arith.subf %156, %158 : vector<1x128xf32>
      %160 = arith.mulf %159, %43 : vector<1x128xf32>
      %161 = vector.shape_cast %160 : vector<1x128xf32> to vector<1x1x128xf32>
      %cst_47 = arith.constant dense<0.000000e+00> : vector<1xf32>
      %162 = vector.multi_reduction <add>, %161, %cst_47 [1, 2] : vector<1x1x128xf32> to vector<1xf32>
      %163 = vector.shape_cast %162 : vector<1xf32> to vector<1x1x1xf32>
      %164 = vector.extract %163[0, 0, 0] : f32 from vector<1x1x1xf32>
      %165 = tpu.iota {dimensions = array<i32: 1>} : vector<1x8x128xi32>
      %c0_i32_48 = arith.constant 0 : i32
      %166 = vector.broadcast %c0_i32_48 : i32 to vector<1x8x128xi32>
      %167 = arith.cmpi eq, %165, %166 : vector<1x8x128xi32>
      %c1_i32 = arith.constant 1 : i32
      %168 = vector.broadcast %c1_i32 : i32 to vector<1x8x128xi32>
      %169 = arith.cmpi eq, %165, %168 : vector<1x8x128xi32>
      %c2_i32 = arith.constant 2 : i32
      %170 = vector.broadcast %c2_i32 : i32 to vector<1x8x128xi32>
      %171 = arith.cmpi eq, %165, %170 : vector<1x8x128xi32>
      %c3_i32 = arith.constant 3 : i32
      %172 = vector.broadcast %c3_i32 : i32 to vector<1x8x128xi32>
      %173 = arith.cmpi eq, %165, %172 : vector<1x8x128xi32>
      %cst_49 = arith.constant 0.000000e+00 : f32
      %174 = vector.broadcast %164 : f32 to vector<1x8x128xf32>
      %175 = vector.broadcast %cst_49 : f32 to vector<1x8x128xf32>
      %176 = arith.select %173, %174, %175 : vector<1x8x128xi1>, vector<1x8x128xf32>
      %177 = vector.broadcast %128 : f32 to vector<1x8x128xf32>
      %178 = arith.select %171, %177, %176 : vector<1x8x128xi1>, vector<1x8x128xf32>
      %179 = vector.broadcast %51 : f32 to vector<1x8x128xf32>
      %180 = arith.select %169, %179, %178 : vector<1x8x128xi1>, vector<1x8x128xf32>
      %181 = vector.broadcast %37 : f32 to vector<1x8x128xf32>
      %182 = arith.select %167, %181, %180 : vector<1x8x128xi1>, vector<1x8x128xf32>
      %c0_50 = arith.constant 0 : index
      %c0_51 = arith.constant 0 : index
      %c0_52 = arith.constant 0 : index
      %183 = vector.load %arg4[%c0_50, %c0_51, %c0_52] : memref<1x8x128xf32, #tpu.memory_space<vmem>>, vector<1x8x128xf32>
      tpu.vector_store %arg4[%c0_50, %c0_51, %c0_52], %182 {strides = array<i32>} : memref<1x8x128xf32, #tpu.memory_space<vmem>>, vector<1x8x128xf32>,
    } else {
    }
    return
  }
  func.func @transform_0(%arg0: i32, %arg1: i32) -> (i32, i32, i32) {
    %c0_i32 = arith.constant 0 : i32
    %c0_i32_0 = arith.constant 0 : i32
    return %arg0, %arg1, %c0_i32 : i32, i32, i32
  }
  func.func @transform_1(%arg0: i32, %arg1: i32) -> (i32, i32, i32) {
    %c0_i32 = arith.constant 0 : i32
    %c0_i32_0 = arith.constant 0 : i32
    %c0_i32_1 = arith.constant 0 : i32
    return %arg0, %c0_i32, %c0_i32_0 : i32, i32, i32
  }
  func.func @transform_2(%arg0: i32, %arg1: i32) -> (i32, i32, i32) {
    %c0_i32 = arith.constant 0 : i32
    %c0_i32_0 = arith.constant 0 : i32
    %c0_i32_1 = arith.constant 0 : i32
    return %arg0, %c0_i32, %c0_i32_0 : i32, i32, i32
  }
}

</mosaic_0001>

<bundles_post_ra>
// kernel: _boxer2d_loss_stack.1
= control target key start
LH: loop header
LB: loop body
LE: loop exit
PB: predicated region body
PF: predicated region fallthrough
CT: control target
= control target key end

     0   :  { %s597_s9 = smov 0   ;;  %s599_s10 = smov 0   ;;  %s686_s0 = inlined_call_operand.vmem [shape: f32[2,16,4], index: 0, kind: input, shape index: {}]   ;;  %s687_s1 = inlined_call_operand.vmem [shape: f32[2,16,128], index: 1, kind: input, shape index: {}]   ;;  %s688_s2 = inlined_call_operand.vmem [shape: f32[2,8,128], index: 2, kind: output, shape index: {}]  }
   0x1   :  { %s601_s11 = smov 0  }
   0x2 LB: > { %s24_s12 = sadd.s32 1, %s575_s10  ;;  %p492_p0 = scmp.ge.s32.totalorder %s579_s11, 1  ;;  %s579_s11 = sphi %s601_s11, %s12_s11   ;;  %s575_s10 = sphi %s599_s10, %s692_s10   ;;  %s571_s9 = sphi %s597_s9, %s691_s9  }
   0x3   : > { %p26_p1 = scmp.ge.s32.totalorder %s24_s12, 2  ;;  %p141_p2 = scmp.lt.s32.totalorder %s579_s11, 3 }
   0x5   : > { %s694_s12 = smov (%p26_p1, %s24_s12), 0  ;;  %p142_p3 = pnand %p492_p0, %p141_p2 }
   0x6   : > { %p172_p4 = scmp.lt.s32.totalorder (!%p142_p3), %s571_s9, 1  ;;  %vm194_vm0 = vcmask (!%p142_p3), 31744   ;;  %v581_v0 = vmov (!%p142_p3), 0.0   ;;  %vm341_vm4 = vcmask (!%p142_p3), 1040384   ;;  %vm279_vm8 = vcmask (!%p142_p3), 1043456  }
   0x7   : > { %145 = sbr.rel (%p142_p3) target bundleno = 294 (0x126), region = 28  ;;  %195 = vst.msk [vmem:[#allocation2] sm:$0xff] (!%p142_p3), %vm194_vm0, %v581_v0 }
   0xe   : > { %s696_s9 = smov (!%p172_p4, %s571_s9), 1 }
   0xf   : > { %s500_s13 = sshll.u32 %s696_s9, 4  ;;  %s497_s23 = sshll.u32 %s696_s9, 3 }
  0x10   : > { %s185_s16 = scalar_lea.vmem %s687_s1, %s500_s13  ;;  %s179_s19 = scalar_lea.vmem %s686_s0, %s500_s13 }
  0x11   : > { %v625_v1 = vld [vmem:[%s185_s16] sm:$0xff]  ;;  %v627_v2 = vld [vmem:[%s185_s16 + $0x8] sm:$0xff]  ;;  %s189_s27 = scalar_lea.vmem %s688_s2, %s497_s23 }
  0x12   : > { %v629_v3 = vld [vmem:[%s179_s19] sm:$0xff]  ;;  %v290_v4 = vmul.f32 0.5, %v625_v1  ;;  %v352_v5 = vand.u32 2147483647, %v627_v2  ;;  %v633_v6 = vld [vmem:[%s179_s19 + $0x8] sm:$0xff]  ;;  %v371_v49 = vmax.f32 %v627_v2, 0.0 }
  0x13   : > { %v198_v7 = vand.u32 2147483647, %v629_v3  ;;  %v199_v8 = vand.u32 2147483647, %v633_v6  ;;  %v338_v53 = vrot.slane %v627_v2, 1  ;;  %vm212_vm1 = vcmp.ge.f32.partialorder %v629_v3, 0.0 }
  0x14   : > { %v292_v9 = vrot.slane %v290_v4, 2  ;;  %v353_v10 = vsub.f32 0.0, %v352_v5  ;;  %vm213_vm2 = vcmp.ge.f32.partialorder %v633_v6, 0.0  ;;  %vm359_vm3 = vcmp.ge.f32.partialorder %v627_v2, 0.0 }
  0x15   : > { %v200_v11 = vsub.f32 0.0, %v198_v7  ;;  %v201_v12 = vsub.f32 0.0, %v199_v8  ;;  %v372_v59 = vsub.f32 %v371_v49, %v627_v2  ;;  %v218_v63 = vmax.f32 %v629_v3, 0.0 }
  0x16   : > { %v294_v13 = vsub.f32 %v625_v1, %v292_v9  ;;  %v295_v14 = vadd.f32 %v292_v9, %v625_v1  ;;  %v354_v15 = vmul.f32 1.442695, %v353_v10  ;;  %v219_v0 = vmax.f32 %v633_v6, 0.0 }
  0x17   : > { %v202_v16 = vmul.f32 1.442695, %v200_v11  ;;  %v204_v17 = vmul.f32 1.442695, %v201_v12 }
  0x18   : > { %v296_v18 = vsub.f32 %v295_v14, %v294_v13  ;;  %v302_v19 = vrot.slane %v295_v14, 4  ;;  %v306_v20 = vrot.slane %v294_v13, 4  ;;  %535 = vpow2.f32 %v354_v15 }
  0x19   : > { %537 = vpow2.f32 %v202_v16 }
  0x1a   : > { %v298_v21 = vrot.slane %v296_v18, 1  ;;  %v304_v22 = vmin.f32 %v295_v14, %v302_v19  ;;  %v308_v23 = vmax.f32 %v294_v13, %v306_v20  ;;  %v320_v24 = vmax.f32 %v295_v14, %v302_v19 }
  0x1b   : > { %v321_v25 = vmin.f32 %v294_v13, %v306_v20  ;;  %539 = vpow2.f32 %v204_v17 }
  0x1c   : > { %v300_v26 = vmul.f32 %v298_v21, %v296_v18  ;;  %v309_v27 = vsub.f32 %v304_v22, %v308_v23 }
  0x1d   : > { %v322_v28 = vsub.f32 %v320_v24, %v321_v25 }
  0x1e   : > { %v310_v29 = vmax.f32 %v309_v27, 0.0  ;;  %v316_v30 = vrot.slane %v300_v26, 4 }
  0x1f   : > { %v323_v31 = vmax.f32 %v322_v28, 0.0 }
  0x20   : > { %v312_v32 = vrot.slane %v310_v29, 1  ;;  %v318_v33 = vadd.f32 %v316_v30, %v300_v26 }
  0x21   : > { %v325_v34 = vrot.slane %v323_v31, 1 }
  0x22   : > { %v536_v35 = vpop.eup %535  ;;  %v314_v36 = vmul.f32 %v312_v32, %v310_v29 }
  0x23   : > { %v538_v37 = vpop.eup %537  ;;  %v327_v38 = vmul.f32 %v325_v34, %v323_v31  ;;  %v356_v39 = vadd.f32 1.0, %v536_v35  ;;  %v365_v46 = vmul.f32 -0.5, %v536_v35  ;;  %v368_v48 = vand.u32 2147483647, %v536_v35 }
  0x24   : > { %v319_v40 = vsub.f32 %v318_v33, %v314_v36  ;;  %v206_v43 = vadd.f32 1.0, %v538_v37  ;;  %v223_v50 = vmul.f32 -0.5, %v538_v37  ;;  %v226_v54 = vand.u32 2147483647, %v538_v37 }
  0x25   : > { %v540_v41 = vpop.eup %539  ;;  %v332_v42 = vmax.f32 %v327_v38, 1e-12  ;;  %541 = vrcp.f32 %v356_v39  ;;  %v366_v47 = vadd.f32 1.0, %v365_v46  ;;  %vm369_vm5 = vcmp.lt.f32.partialorder %v368_v48, 0.0004427343 }
  0x26   : > { %v328_v44 = vmax.f32 %v319_v40, 1e-12  ;;  %543 = vlog2.f32 %v356_v39  ;;  %v207_v45 = vadd.f32 1.0, %v540_v41  ;;  %v232_v51 = vmul.f32 -0.5, %v540_v41 }
  0x27   : > { %545 = vrcp.f32 %v332_v42  ;;  %v331_v52 = vsub.f32 %v327_v38, %v319_v40  ;;  %v367_v56 = vmul.f32 %v536_v35, %v366_v47  ;;  %v224_v60 = vadd.f32 1.0, %v223_v50 }
  0x28   : > { %547 = vrcp.f32 %v328_v44  ;;  %v233_v4 = vadd.f32 1.0, %v232_v51  ;;  %vm647_vm6 = vcmp.lt.f32.partialorder %v226_v54, 0.0004427343  ;;  %v235_v10 = vand.u32 2147483647, %v540_v41  ;;  %v246_v54 = vld [vmem:[#allocation2] sm:$0xff] }
  0x29   : > { %549 = vrcp.f32 %v206_v43  ;;  %v225_v20 = vmul.f32 %v538_v37, %v224_v60  ;;  %v270_v51 = vrot.slane %v625_v1, 4 }
  0x2a   : > { %551 = vrcp.f32 %v207_v45  ;;  %v234_v25 = vmul.f32 %v540_v41, %v233_v4  ;;  %vm236_vm7 = vcmp.lt.f32.partialorder %v235_v10, 0.0004427343 }
  0x2b   : > { %553 = vlog2.f32 %v206_v43 }
  0x2c   : > { %555 = vlog2.f32 %v207_v45  ;;  %v274_v45 = vlaneseq }
  0x2f   : > { %v542_v55 = vpop.eup %541 }
  0x30   : > { %v544_v57 = vpop.eup %543  ;;  %v360_v58 = vmul.f32 %v542_v55, %v536_v35 }
  0x31   : > { %v546_v61 = vpop.eup %545  ;;  %v364_v62 = vmul.f32 0.6931472, %v544_v57 }
  0x32   : > { %v548_v5 = vpop.eup %547  ;;  %v334_v7 = vmul.f32 %v546_v61, %v331_v52  ;;  %v361_v8 = vsel %vm359_vm3, %v542_v55, %v360_v58  ;;  %v661_v52 = vshrl.u32 %v274_v45, 7  ;;  %v272_v58 = vsub.f32 %v625_v1, %v270_v51 }
  0x33   : > { %v550_v11 = vpop.eup %549  ;;  %v330_v12 = vmul.f32 %v548_v5, %v314_v36  ;;  %v370_v13 = vsel %vm369_vm5, %v367_v56, %v364_v62  ;;  %v375_v14 = vsub.f32 1.0, %v361_v8  ;;  %v378_v15 = vmul.f32 %v361_v8, %v361_v8 }
  0x34   : > { %v552_v16 = vpop.eup %551  ;;  %v373_v17 = vadd.f32 %v372_v59, %v370_v13  ;;  %v374_v18 = vadd.f32 %v371_v49, %v370_v13  ;;  %v214_v19 = vmul.f32 %v550_v11, %v538_v37  ;;  %v273_v59 = vand.u32 2147483647, %v272_v58 }
  0x35   : > { %v554_v21 = vpop.eup %553  ;;  %v335_v22 = vsub.f32 %v330_v12, %v334_v7  ;;  %v376_v23 = vmul.f32 %v375_v14, %v375_v14  ;;  %v215_v24 = vmul.f32 %v552_v16, %v540_v41  ;;  %vm399_vm9 = vcmp.eq.s32.totalorder %v661_v52, 3 }
  0x36   : > { %v556_v26 = vpop.eup %555  ;;  %v379_v27 = vmul.f32 %v378_v15, %v374_v18  ;;  %v216_v28 = vsel %vm212_vm1, %v550_v11, %v214_v19  ;;  %v222_v29 = vmul.f32 0.6931472, %v554_v21  ;;  %vm398_vm10 = vcmp.eq.s32.totalorder %v661_v52, 2 }
  0x37   : > { %v336_v30 = vsub.f32 1.0, %v335_v22  ;;  %v377_v31 = vmul.f32 %v376_v23, %v373_v17  ;;  %v217_v32 = vsel %vm213_vm2, %v552_v16, %v215_v24  ;;  %v231_v33 = vmul.f32 0.6931472, %v556_v26 }
  0x38   : > { %v381_v34 = vmul.f32 0.75, %v379_v27  ;;  %v228_v35 = vsel %vm647_vm6, %v225_v20, %v222_v29  ;;  %v240_v36 = vmul.f32 %v216_v28, %v216_v28  ;;  %v241_v37 = vmul.f32 %v217_v32, %v217_v32 }
  0x39   : > { %v340_v38 = vmul.f32 %v338_v53, %v336_v30  ;;  %v380_v39 = vmul.f32 0.25, %v377_v31  ;;  %v237_v40 = vsel %vm236_vm7, %v234_v25, %v231_v33  ;;  %v238_v41 = vadd.f32 %v228_v35, %v218_v63 }
  0x3a   : > { %v239_v3 = vadd.f32 %v237_v40, %v219_v0  ;;  %vm397_vm11 = vcmp.eq.s32.totalorder %v661_v52, 1  ;;  %vm396_vm12 = vcmp.eq.s32.totalorder %v661_v52, 0 }
  0x3b   : > { %v342_v42 = vsel %vm341_vm4, %v340_v38, 0.0  ;;  %v382_v43 = vsub.f32 %v380_v39, %v381_v34  ;;  %v242_v44 = vmul.f32 %v240_v36, %v238_v41 }
  0x3c   : > { %343 = vadd.xlane.f32.xlu1 %v342_v42  ;;  %v243_v6 = vmul.f32 %v241_v37, %v239_v3 }
  0x3d   : > { %v383_v46 = vmul.f32 %v382_v43, %v338_v53  ;;  %v244_v47 = vmul.f32 0.75, %v242_v44  ;;  %v276_v53 = vsub.s32 1, %v661_v52 }
  0x3e   : > { %v245_v48 = vmul.f32 0.75, %v243_v6 }
  0x3f   : > { %v384_v49 = vsel %vm341_vm4, %v383_v46, 0.0  ;;  %v248_v50 = vsel %vm194_vm0, %v244_v47, 0.0  ;;  %v277_v60 = vrot.slane %v627_v2, %v276_v53 }
  0x40   : > { %385 = vadd.xlane.f32.xlu1 %v384_v49  ;;  %v249_v55 = vsel %vm194_vm0, %v245_v48, 0.0 }
  0x41   : > { %v250_v56 = vadd.f32 %v249_v55, %v248_v50  ;;  %v278_v61 = vmul.f32 %v277_v60, %v273_v59 }
  0x43   : > { %v251_v57 = vadd.f32 %v250_v56, %v246_v54  ;;  %v280_v0 = vsel %vm279_vm8, %v278_v61, 0.0 }
  0x45   : > { %252 = vst.msk [vmem:[#allocation2] sm:$0xff] %vm194_vm0, %v251_v57 }
  0x4c   : > { %v256_v62 = vld [vmem:[#allocation2] sm:$0xff] }
  0x4d   : > { %v257_v63 = vsel %vm194_vm0, %v256_v62, 0.0 }
  0x4e   : > { %258 = vadd.xlane.f32.xlu0 %v257_v63 }
  0x52   : > { %281 = vadd.xlane.f32.xlu0 %v280_v0 }
  0xc9   : > { %v344_v4 = vpop.xlane.xlu1 %343 }
  0xca   : > { %v345_v7 = vrot.slane %v344_v4, 4 }
  0xcc   : > { %v346_v1 = vadd.f32 %v345_v7, %v344_v4 }
  0xcd   : > { %v386_v5 = vpop.xlane.xlu1 %385 }
  0xce   : > { %v387_v8 = vrot.slane %v386_v5, 4  ;;  %v347_v13 = vrot.slane %v346_v1, 2 }
  0xd0   : > { %v388_v10 = vadd.f32 %v387_v8, %v386_v5  ;;  %v348_v19 = vadd.f32 %v347_v13, %v346_v1 }
  0xd2   : > { %v389_v2 = vrot.slane %v388_v10, 2  ;;  %v349_v25 = vrot.slane %v348_v19, 1 }
  0xd4   : > { %v390_v20 = vadd.f32 %v389_v2, %v388_v10  ;;  %v350_v29 = vadd.f32 %v349_v25, %v348_v19 }
  0xd6   : > { %v391_v27 = vrot.slane %v390_v20, 1 }
  0xd8   : > { %v392_v30 = vadd.f32 %v391_v27, %v390_v20 }
  0xdb   : > { %v259_v9 = vpop.xlane.xlu0 %258 }
  0xdc   : > { %v260_v11 = vrot.slane %v259_v9, 4 }
  0xde   : > { %v261_v12 = vadd.f32 %v260_v11, %v259_v9 }
  0xdf   : > { %v282_v14 = vpop.xlane.xlu0 %281 }
  0xe0   : > { %v262_v15 = vrot.slane %v261_v12, 2  ;;  %v283_v16 = vrot.slane %v282_v14, 4 }
  0xe2   : > { %v284_v17 = vadd.f32 %v283_v16, %v282_v14  ;;  %v263_v18 = vadd.f32 %v262_v15, %v261_v12 }
  0xe4   : > { %v285_v21 = vrot.slane %v284_v17, 2  ;;  %v264_v22 = vrot.slane %v263_v18, 1 }
  0xe6   : > { %v286_v23 = vadd.f32 %v285_v21, %v284_v17  ;;  %v265_v24 = vadd.f32 %v264_v22, %v263_v18 }
  0xe8   : > { %502 = vpush %v265_v24  ;;  %v287_v26 = vrot.slane %v286_v23, 1 }
  0xea   : > { %v288_v28 = vadd.f32 %v287_v26, %v286_v23 }
  0xec   : > { %504 = vpush %v288_v28 }
  0xed   : > { %506 = vpush %v350_v29 }
  0xee   : > { %508 = vpush %v392_v30 }
 0x119   : > { %s503_s20 = spop %502 }
 0x11a   : > { %v406_v36 = vstv %s503_s20 }
 0x11d   : > { %s505_s21 = spop %504 }
 0x11e   : > { %s507_s22 = spop %506  ;;  %v404_v34 = vstv %s505_s21 }
 0x11f   : > { %v402_v31 = vstv %s507_s22  ;;  %s509_s24 = spop %508 }
 0x120   : > { %v400_v32 = vstv %s509_s24 }
 0x121   : > { %v401_v33 = vsel %vm399_vm9, %v400_v32, 0.0 }
 0x122   : > { %v403_v35 = vsel %vm398_vm10, %v402_v31, %v401_v33 }
 0x123   : > { %v405_v37 = vsel %vm397_vm11, %v404_v34, %v403_v35 }
 0x124   : > { %v407_v38 = vsel %vm396_vm12, %v406_v36, %v405_v37 }
 0x125   : > { %408 = vst [vmem:[%s189_s27] sm:$0xff] %v407_v38 }
 0x126 PF: > { %s12_s11 = sadd.s32 1, %s579_s11   ;;  %s691_s9 = smov %s575_s10 }
 0x127   : > { %p9_p5 = scmp.ge.s32.totalorder %s12_s11, 4   ;;  %s692_s10 = smov %s694_s12 }
 0x129   :  { %11 = sbr.rel (!%p9_p5) target bundleno = 2 (0x2), region = 69 }

</bundles_post_ra>
